<compile_context>
chip_gen: v7x
topology: tpu7x:2x2x1
jax: 0.10.0
libtpu: 0.0.40
codegen_flags: <defaults>
</compile_context>

<pallas_src>
import functools

import jax
import jax.numpy as jnp
from jax.experimental import pallas as pl
from jax.experimental.pallas import tpu as pltpu


def _round_up(x, m):
    return (x + m - 1) // m * m


def _contour_kernel(fea_ref, kq_ref, vp_ref, g_ref, b_ref, bp_ref, out_ref,
                    *, num_heads, n_tokens):
    """One batch tile: (BT, N, C) raw tokens in -> (BT, N-2, C) out."""
    # Feature tokens 1 .. N-2 of this batch tile (static sublane-offset slice
    # of the VMEM block; token 0 and the contour token are not computed on).
    rows = fea_ref[:, 1:n_tokens - 1, :].astype(jnp.float32)      # (BT, M, C)

    # ---- LayerNorm over channels (biased variance, eps=1e-5), kept in f32 ----
    mean = jnp.mean(rows, axis=-1, keepdims=True)
    xc = rows - mean
    var = jnp.mean(xc * xc, axis=-1, keepdims=True)
    x = xc * jax.lax.rsqrt(var + 1e-5)
    x = x * g_ref[...] + b_ref[...]                               # (1,C) bcast

    # ---- rank-1 attention + output projection, folded per (batch, head) -----
    # TODO(synk): attn_drop / proj_drop are nn.Dropout(p=0.0) -> identity here.
    acc = rows + bp_ref[...]                                      # residual + proj bias
    for h in range(num_heads):                                    # static, small H
        kq_h = kq_ref[:, h, :][:, None, :]                        # (BT, 1, C) f32
        vp_h = vp_ref[:, h, :][:, None, :]                        # (BT, 1, C) f32
        score = jnp.sum(x * kq_h, axis=-1, keepdims=True)         # lane reduce -> (BT, M, 1)
        acc = acc + jax.nn.sigmoid(score) * vp_h                  # AXPY (VPU)
    out_ref[...] = acc.astype(out_ref.dtype)


def _pick_batch_tile(B, N, C, M, H, fea_bytes, target_rows, vmem_budget):
    """Choose the batch tile from a VMEM budget + dual-TC / no-padding rules."""
    # Bytes resident per batch row of a tile: fea & out double-buffers, the
    # per-batch kq/vp blocks, plus ~6 live f32 (M, C) temporaries in-kernel.
    per_batch = (2 * N * C * fea_bytes + 2 * M * C * fea_bytes
                 + 4 * H * C * 4 + 6 * M * C * 4)
    bt = max(1, min(B,
                    max(1, target_rows // max(M, 1)),
                    max(1, vmem_budget // max(per_batch, 1))))
    if B >= 2:                      # >=2 grid steps so v7x dual-TC sharding helps
        bt = min(bt, (B + 1) // 2)
    # Prefer a tile that divides B (no batch padding => no fea copy in HBM),
    # unless that would shrink the tile by more than 2x.
    best_div = 1
    for cand in range(bt, 0, -1):
        if B % cand == 0:
            best_div = cand
            break
    if best_div * 2 >= bt:
        bt = best_div
    return max(1, bt)


def contour_token_inference(fea, params, num_heads=1, batch_tile=None,
                            target_rows=1024):
    """Pallas implementation of the module's forward pass.

    fea: (B, N, C).  Token N-1 is the contour token T_s, tokens 1..N-2 are F_s.
    Returns (B, N-2, C).
    """
    B, N, C = fea.shape
    assert N >= 3, "need at least one feature token between token 0 and T_s"
    assert C % num_heads == 0, "channels must split evenly per head"
    M = N - 2
    H = num_heads
    D = C // H
    scale = D ** (-0.5)

    f32 = jnp.float32
    gamma = params["gamma"].astype(f32).reshape(1, C)
    beta = params["beta"].astype(f32).reshape(1, C)
    bp = params["bp"].astype(f32).reshape(1, C)
    wq = params["wq"].astype(f32)        # PyTorch Linear layout: y = x @ W.T
    wk = params["wk"].astype(f32)
    wv = params["wv"].astype(f32)
    wp = params["wp"].astype(f32)

    # ---- XLA-side prep (B rows only — tiny): contour-token LN, k/v proj, and
    # the rank-1 fold of Wq / Wp into per-(batch, head) vectors. --------------
    t = fea[:, -1, :].astype(f32)                                   # (B, C)
    t_mean = jnp.mean(t, axis=-1, keepdims=True)
    t_c = t - t_mean
    t_var = jnp.mean(t_c * t_c, axis=-1, keepdims=True)
    t_n = t_c * jax.lax.rsqrt(t_var + 1e-5) * gamma + beta          # (B, C)
    k = t_n @ wk.T                                                  # (B, C)
    v = t_n @ wv.T                                                  # (B, C)
    # kq[b,h,c] = scale * sum_d Wq[h*D+d, c] * k[b, h*D+d]
    kq = scale * jnp.einsum("bhd,hdc->bhc", k.reshape(B, H, D),
                            wq.reshape(H, D, C))                    # (B, H, C)
    # vp[b,h,c] = sum_d v[b, h*D+d] * Wp[c, h*D+d]
    vp = jnp.einsum("bhd,chd->bhc", v.reshape(B, H, D),
                    wp.reshape(C, H, D))                            # (B, H, C)

    fea_bytes = jnp.dtype(fea.dtype).itemsize
    if batch_tile is None:
        bt = _pick_batch_tile(B, N, C, M, H, fea_bytes, target_rows,
                              vmem_budget=40 << 20)
    else:
        bt = max(1, min(batch_tile, B))

    B_pad = _round_up(B, bt)
    fea_in = fea
    if B_pad != B:
        pad = ((0, B_pad - B), (0, 0), (0, 0))
        fea_in = jnp.pad(fea, pad)
        kq = jnp.pad(kq, pad)
        vp = jnp.pad(vp, pad)

    # VMEM accounting: double-buffered I/O blocks + invariants + temporaries,
    # clamped to ~85% of physical VMEM (64 MiB on v7x, 128 MiB on v5e/v6e).
    need = (2 * bt * N * C * fea_bytes + 2 * bt * M * C * fea_bytes
            + 4 * bt * H * C * 4 + 6 * C * 4 + 6 * bt * M * C * 4)
    try:
        cap = int(getattr(pltpu.get_tpu_info(), "vmem_capacity_bytes", 64 << 20))
    except Exception:
        cap = 64 << 20
    vmem_limit = int(min(max(2 * need, 16 << 20), int(0.85 * cap)))

    flops = B_pad * M * C * (6 + 4 * H)
    transcendentals = B_pad * M * (H + 1)              # sigmoid + rsqrt per row
    bytes_accessed = (B_pad * N * C * fea_bytes        # fea read
                      + B_pad * M * C * fea_bytes      # output write
                      + 2 * B_pad * H * C * 4          # kq / vp
                      + 3 * C * 4)                     # gamma / beta / bp

    kernel = functools.partial(_contour_kernel, num_heads=H, n_tokens=N)

    batch_block = lambda b: (b, 0, 0)
    const_block = lambda b: (0, 0)

    out = pl.pallas_call(
        kernel,
        out_shape=jax.ShapeDtypeStruct((B_pad, M, C), fea.dtype),
        grid=(B_pad // bt,),
        in_specs=[
            pl.BlockSpec((bt, N, C), batch_block),     # raw tokens (no HBM slab)
            pl.BlockSpec((bt, H, C), batch_block),     # kq per (batch, head)
            pl.BlockSpec((bt, H, C), batch_block),     # vp per (batch, head)
            pl.BlockSpec((1, C), const_block),         # gamma
            pl.BlockSpec((1, C), const_block),         # beta
            pl.BlockSpec((1, C), const_block),         # proj bias
        ],
        out_specs=pl.BlockSpec((bt, M, C), batch_block),
        compiler_params=pltpu.CompilerParams(
            dimension_semantics=("parallel",),
            vmem_limit_bytes=vmem_limit),
        cost_estimate=pl.CostEstimate(
            flops=int(flops),
            transcendentals=int(transcendentals),
            bytes_accessed=int(bytes_accessed)),
    )(fea_in, kq, vp, gamma, beta, bp)

    return out[:B]


def reference(fea, params, num_heads=1):
    """Pure-JAX mirror of the PyTorch forward (for correctness checking)."""
    B, N, C = fea.shape
    head_dim = C // num_heads
    scale = head_dim ** (-0.5)

    mean = jnp.mean(fea, axis=-1, keepdims=True)
    var = jnp.mean((fea - mean) ** 2, axis=-1, keepdims=True)
    x = (fea - mean) / jnp.sqrt(var + 1e-5) * params["gamma"] + params["beta"]

    t_s = x[:, -1:, :]
    f_s = x[:, 1:-1, :]
    q = (f_s @ params["wq"].T).reshape(B, N - 2, num_heads, head_dim).transpose(0, 2, 1, 3)
    k = (t_s @ params["wk"].T).reshape(B, 1, num_heads, head_dim).transpose(0, 2, 1, 3)
    v = (t_s @ params["wv"].T).reshape(B, 1, num_heads, head_dim).transpose(0, 2, 1, 3)
    attn = jax.nn.sigmoid((q @ jnp.swapaxes(k, -2, -1)) * scale)
    infer = (attn @ v).transpose(0, 2, 1, 3).reshape(B, N - 2, C)
    infer = infer @ params["wp"].T + params["bp"]
    return infer + fea[:, 1:-1, :]


if __name__ == "__main__":
    B, N, C = 2, 8, 32

    key = jax.random.PRNGKey(0)
    keys = jax.random.split(key, 8)
    fea = jax.random.normal(keys[0], (B, N, C), dtype=jnp.float32)

    params = {
        "gamma": 1.0 + 0.1 * jax.random.normal(keys[1], (C,), jnp.float32),
        "beta": 0.1 * jax.random.normal(keys[2], (C,), jnp.float32),
        "wq": 0.1 * jax.random.normal(keys[3], (C, C), jnp.float32),
        "wk": 0.1 * jax.random.normal(keys[4], (C, C), jnp.float32),
        "wv": 0.1 * jax.random.normal(keys[5], (C, C), jnp.float32),
        "wp": 0.1 * jax.random.normal(keys[6], (C, C), jnp.float32),
        "bp": 0.1 * jax.random.normal(keys[7], (C,), jnp.float32),
    }

    # 1) module default (num_heads=1); kernel is fully f32 -> tight tolerance
    ref1 = reference(fea, params, num_heads=1)
    out1 = jax.block_until_ready(
        contour_token_inference(fea, params, num_heads=1))
    assert out1.shape == (B, N - 2, C)
    assert jnp.allclose(out1, ref1, atol=1e-4, rtol=1e-4), (
        f"h1 max abs err = {jnp.max(jnp.abs(out1 - ref1))}")

    # 2) multi-head path (per-head lane-reduction + AXPY)
    ref4 = reference(fea, params, num_heads=4)
    out4 = jax.block_until_ready(
        contour_token_inference(fea, params, num_heads=4))
    assert jnp.allclose(out4, ref4, atol=1e-4, rtol=1e-4), (
        f"h4 max abs err = {jnp.max(jnp.abs(out4 - ref4))}")

    # 3) bf16 input streaming (native-dtype DMA, f32 compute in-kernel)
    fea_bf = fea.astype(jnp.bfloat16)
    ref_bf = reference(fea_bf.astype(jnp.float32), params, num_heads=1)
    out_bf = jax.block_until_ready(
        contour_token_inference(fea_bf, params, num_heads=1))
    assert out_bf.dtype == jnp.bfloat16
    assert jnp.allclose(out_bf.astype(jnp.float32), ref_bf,
                        atol=5e-2, rtol=5e-2), (
        f"bf16 max abs err = {jnp.max(jnp.abs(out_bf.astype(jnp.float32) - ref_bf))}")

    print("KERNEL_OK")
</pallas_src>

<mosaic_0001>
module attributes {stable_mosaic.version = 11 : i64} {
  func.func @_contour_kernel(%arg0: i32, %arg1: memref<1x8x32xf32, #tpu.memory_space<vmem>>, %arg2: memref<1x1x32xf32, #tpu.memory_space<vmem>>, %arg3: memref<1x1x32xf32, #tpu.memory_space<vmem>>, %arg4: memref<1x32xf32, #tpu.memory_space<vmem>>, %arg5: memref<1x32xf32, #tpu.memory_space<vmem>>, %arg6: memref<1x32xf32, #tpu.memory_space<vmem>>, %arg7: memref<1x6x32xf32, #tpu.memory_space<vmem>>) attributes {dimension_semantics = [#tpu.dimension_semantics<parallel>], iteration_bounds = array<i64: 2>, scalar_prefetch = 0 : i64, scratch_operands = 0 : i64, tpu.core_type = #tpu.core_type<tc>, window_params = [{transform_indices = @transform_0, window_bounds = array<i64: 1, 8, 32>}, {transform_indices = @transform_1, window_bounds = array<i64: 1, 1, 32>}, {transform_indices = @transform_2, window_bounds = array<i64: 1, 1, 32>}, {pipeline_mode = #tpu.pipeline_mode<synchronous>, transform_indices = @transform_3, window_bounds = array<i64: 1, 32>}, {pipeline_mode = #tpu.pipeline_mode<synchronous>, transform_indices = @transform_4, window_bounds = array<i64: 1, 32>}, {pipeline_mode = #tpu.pipeline_mode<synchronous>, transform_indices = @transform_5, window_bounds = array<i64: 1, 32>}, {transform_indices = @transform_6, window_bounds = array<i64: 1, 6, 32>}]} {
    %c0 = arith.constant 0 : index
    %c1 = arith.constant 1 : index
    %c0_0 = arith.constant 0 : index
    %0 = vector.load %arg1[%c0, %c1, %c0_0] : memref<1x8x32xf32, #tpu.memory_space<vmem>>, vector<1x6x32xf32>
    %cst = arith.constant dense<0.000000e+00> : vector<1x6xf32>
    %1 = vector.multi_reduction <add>, %0, %cst [2] : vector<1x6x32xf32> to vector<1x6xf32>
    %2 = vector.shape_cast %1 : vector<1x6xf32> to vector<1x6x1xf32>
    %cst_1 = arith.constant 3.200000e+01 : f32
    %3 = vector.broadcast %cst_1 : f32 to vector<1x6x1xf32>
    %4 = arith.divf %2, %3 : vector<1x6x1xf32>
    %5 = vector.broadcast %4 : vector<1x6x1xf32> to vector<1x6x32xf32>
    %6 = arith.subf %0, %5 : vector<1x6x32xf32>
    %7 = arith.mulf %6, %6 : vector<1x6x32xf32>
    %cst_2 = arith.constant dense<0.000000e+00> : vector<1x6xf32>
    %8 = vector.multi_reduction <add>, %7, %cst_2 [2] : vector<1x6x32xf32> to vector<1x6xf32>
    %9 = vector.shape_cast %8 : vector<1x6xf32> to vector<1x6x1xf32>
    %cst_3 = arith.constant 3.200000e+01 : f32
    %10 = vector.broadcast %cst_3 : f32 to vector<1x6x1xf32>
    %11 = arith.divf %9, %10 : vector<1x6x1xf32>
    %cst_4 = arith.constant 9.99999974E-6 : f32
    %12 = vector.broadcast %cst_4 : f32 to vector<1x6x1xf32>
    %13 = arith.addf %11, %12 : vector<1x6x1xf32>
    %14 = math.rsqrt %13 : vector<1x6x1xf32>
    %15 = vector.broadcast %14 : vector<1x6x1xf32> to vector<1x6x32xf32>
    %16 = arith.mulf %6, %15 : vector<1x6x32xf32>
    %c0_5 = arith.constant 0 : index
    %c0_6 = arith.constant 0 : index
    %17 = vector.load %arg4[%c0_5, %c0_6] : memref<1x32xf32, #tpu.memory_space<vmem>>, vector<1x32xf32>
    %18 = vector.shape_cast %17 : vector<1x32xf32> to vector<1x1x32xf32>
    %19 = vector.broadcast %18 : vector<1x1x32xf32> to vector<1x6x32xf32>
    %20 = arith.mulf %16, %19 : vector<1x6x32xf32>
    %c0_7 = arith.constant 0 : index
    %c0_8 = arith.constant 0 : index
    %21 = vector.load %arg5[%c0_7, %c0_8] : memref<1x32xf32, #tpu.memory_space<vmem>>, vector<1x32xf32>
    %22 = vector.shape_cast %21 : vector<1x32xf32> to vector<1x1x32xf32>
    %23 = vector.broadcast %22 : vector<1x1x32xf32> to vector<1x6x32xf32>
    %24 = arith.addf %20, %23 : vector<1x6x32xf32>
    %c0_9 = arith.constant 0 : index
    %c0_10 = arith.constant 0 : index
    %25 = vector.load %arg6[%c0_9, %c0_10] : memref<1x32xf32, #tpu.memory_space<vmem>>, vector<1x32xf32>
    %26 = vector.shape_cast %25 : vector<1x32xf32> to vector<1x1x32xf32>
    %27 = vector.broadcast %26 : vector<1x1x32xf32> to vector<1x6x32xf32>
    %28 = arith.addf %0, %27 : vector<1x6x32xf32>
    %c0_11 = arith.constant 0 : index
    %c0_12 = arith.constant 0 : index
    %c0_13 = arith.constant 0 : index
    %29 = vector.load %arg2[%c0_11, %c0_12, %c0_13] : memref<1x1x32xf32, #tpu.memory_space<vmem>>, vector<1x1x32xf32>
    %30 = vector.shape_cast %29 : vector<1x1x32xf32> to vector<1x32xf32>
    %31 = vector.shape_cast %30 : vector<1x32xf32> to vector<1x1x32xf32>
    %c0_14 = arith.constant 0 : index
    %c0_15 = arith.constant 0 : index
    %c0_16 = arith.constant 0 : index
    %32 = vector.load %arg3[%c0_14, %c0_15, %c0_16] : memref<1x1x32xf32, #tpu.memory_space<vmem>>, vector<1x1x32xf32>
    %33 = vector.shape_cast %32 : vector<1x1x32xf32> to vector<1x32xf32>
    %34 = vector.shape_cast %33 : vector<1x32xf32> to vector<1x1x32xf32>
    %35 = vector.broadcast %31 : vector<1x1x32xf32> to vector<1x6x32xf32>
    %36 = arith.mulf %24, %35 : vector<1x6x32xf32>
    %cst_17 = arith.constant dense<0.000000e+00> : vector<1x6xf32>
    %37 = vector.multi_reduction <add>, %36, %cst_17 [2] : vector<1x6x32xf32> to vector<1x6xf32>
    %38 = vector.shape_cast %37 : vector<1x6xf32> to vector<1x6x1xf32>
    %39 = arith.negf %38 : vector<1x6x1xf32>
    %40 = math.exp %39 : vector<1x6x1xf32>
    %cst_18 = arith.constant 1.000000e+00 : f32
    %41 = vector.broadcast %cst_18 : f32 to vector<1x6x1xf32>
    %42 = arith.addf %41, %40 : vector<1x6x1xf32>
    %43 = arith.divf %41, %42 : vector<1x6x1xf32>
    %44 = vector.broadcast %43 : vector<1x6x1xf32> to vector<1x6x32xf32>
    %45 = vector.broadcast %34 : vector<1x1x32xf32> to vector<1x6x32xf32>
    %46 = arith.mulf %44, %45 : vector<1x6x32xf32>
    %47 = arith.addf %28, %46 : vector<1x6x32xf32>
    %c0_19 = arith.constant 0 : index
    %c0_20 = arith.constant 0 : index
    %c0_21 = arith.constant 0 : index
    %48 = vector.load %arg7[%c0_19, %c0_20, %c0_21] : memref<1x6x32xf32, #tpu.memory_space<vmem>>, vector<1x6x32xf32>
    tpu.vector_store %arg7[%c0_19, %c0_20, %c0_21], %47 {strides = array<i32>} : memref<1x6x32xf32, #tpu.memory_space<vmem>>, vector<1x6x32xf32>,
    return
  }
  func.func @transform_0(%arg0: i32) -> (i32, i32, i32) {
    %c0_i32 = arith.constant 0 : i32
    %c0_i32_0 = arith.constant 0 : i32
    %c0_i32_1 = arith.constant 0 : i32
    return %arg0, %c0_i32, %c0_i32_0 : i32, i32, i32
  }
  func.func @transform_1(%arg0: i32) -> (i32, i32, i32) {
    %c0_i32 = arith.constant 0 : i32
    %c0_i32_0 = arith.constant 0 : i32
    %c0_i32_1 = arith.constant 0 : i32
    return %arg0, %c0_i32, %c0_i32_0 : i32, i32, i32
  }
  func.func @transform_2(%arg0: i32) -> (i32, i32, i32) {
    %c0_i32 = arith.constant 0 : i32
    %c0_i32_0 = arith.constant 0 : i32
    %c0_i32_1 = arith.constant 0 : i32
    return %arg0, %c0_i32, %c0_i32_0 : i32, i32, i32
  }
  func.func @transform_3(%arg0: i32) -> (i32, i32) {
    %c0_i32 = arith.constant 0 : i32
    %c0_i32_0 = arith.constant 0 : i32
    %c0_i32_1 = arith.constant 0 : i32
    return %c0_i32, %c0_i32_0 : i32, i32
  }
  func.func @transform_4(%arg0: i32) -> (i32, i32) {
    %c0_i32 = arith.constant 0 : i32
    %c0_i32_0 = arith.constant 0 : i32
    %c0_i32_1 = arith.constant 0 : i32
    return %c0_i32, %c0_i32_0 : i32, i32
  }
  func.func @transform_5(%arg0: i32) -> (i32, i32) {
    %c0_i32 = arith.constant 0 : i32
    %c0_i32_0 = arith.constant 0 : i32
    %c0_i32_1 = arith.constant 0 : i32
    return %c0_i32, %c0_i32_0 : i32, i32
  }
  func.func @transform_6(%arg0: i32) -> (i32, i32, i32) {
    %c0_i32 = arith.constant 0 : i32
    %c0_i32_0 = arith.constant 0 : i32
    %c0_i32_1 = arith.constant 0 : i32
    return %arg0, %c0_i32, %c0_i32_0 : i32, i32, i32
  }
}

</mosaic_0001>

<bundles_post_ra>
// kernel: tpu_custom_call.1
= control target key start
LH: loop header
LB: loop body
LE: loop exit
PB: predicated region body
PF: predicated region fallthrough
CT: control target
= control target key end

     0   :  { %11 = vsyncpa [#allocation3], 0  ;;  %s734_s0 = inlined_call_operand.hbm [shape: f32[2,8,32], index: 0, kind: input, shape index: {}]   ;;  %s735_s1 = inlined_call_operand.vmem [shape: f32[2,1,32], index: 1, kind: input, shape index: {}]   ;;  %s736_s2 = inlined_call_operand.vmem [shape: f32[2,1,32], index: 2, kind: input, shape index: {}]   ;;  %s737_s3 = inlined_call_operand.vmem [shape: f32[1,32], index: 3, kind: input, shape index: {}]   ;;  %s738_s4 = inlined_call_operand.vmem [shape: f32[1,32], index: 4, kind: input, shape index: {}]   ;;  %s739_s5 = inlined_call_operand.vmem [shape: f32[1,32], index: 5, kind: input, shape index: {}]   ;;  %s740_s6 = inlined_call_operand.vmem [shape: f32[2,6,32], index: 6, kind: output, shape index: {}]  }
   0x1   :  { %13 = vsyncpa [#allocation3 + $0x1], 0  ;;  %s608_s21 = smov 0   ;;  %s610_s22 = smov 0  }
   0x2   :  { %s612_s23 = smov 0   ;;  %s614_s24 = smov 0  }
   0x3 LB: > { %s627_s25 = sadd.s32 4294967295, %s570_s24   ;;  %s630_s26 = sadd.s32 1, %s570_s24   ;;  %s570_s24 = sphi %s614_s24, %s748_s24   ;;  %s566_s23 = sphi %s612_s23, %s747_s23   ;;  %s562_s22 = sphi %s610_s22, %s746_s22   ;;  %s558_s21 = sphi %s608_s21, %s745_s21  }
   0x4   : > { %s23_s27 = ssub.s32 %s570_s24, %s630_s26  ;;  %s26_s28 = sadd.s32 1, %s566_s23 }
   0x5   : > { %p24_p0 = scmp.eq.s32.totalorder %s23_s27, 0  ;;  %p33_p1 = scmp.ne.s32.totalorder %s566_s23, %s562_s22 }
   0x6   : > { %p34_p2 = scmp.eq.s32.totalorder %s570_s24, 0  ;;  %p39_p3 = scmp.ne.s32.totalorder %s562_s22, %s558_s21 }
   0x7   : > { %s640_s29 = scalar_select %p24_p0, %s566_s23, %s26_s28  }
   0x8   : > { %p35_p4 = por %p34_p2, %p33_p1  ;;  %p40_p5 = scmp.eq.s32.totalorder %s627_s25, 0 }
   0x9   : > { %p467_p6 = scmp.lt.s32.totalorder %s570_s24, 2  ;;  %s213_s7 = sand.u32 1, %s566_s23  }
   0xa   : > { %p644_p7 = por %p40_p5, %p39_p3  ;;  %s448_s8 = sshll.u32 %s213_s7, 3 }
   0xb   : > { %s449_s9 = sshll.u32 %s570_s24, 7  ;;  %s217_s13 = scalar_lea.vmem [#allocation2], %s448_s8 }
   0xc   : > { %s653_s12 = scalar_lea.hbm %s734_s0, %s449_s9  ;;  %s224_s14 = sshll.u32 %s217_s13, 4  ;;  %s655_s14 = int_to_ptr.vmem [resolvable:$true] %s224_s14 }
   0xd   : > { %p657_p8 = pnand %p467_p6, %p35_p4  ;;  %s214_s16 = scalar_lea.sflag [#allocation3], %s213_s7 }
   0xe   : > { %s506_s17 = scalar_lea.hbm %s653_s12, 128  ;;  %s511_s20 = scalar_lea.hbm %s734_s0, 256 }
   0xf   : > { %p507_p11 = scmp.ne.s32.totalorder %s653_s12, %s506_s17  ;;  %p508_p12 = pneg %p657_p8 }
  0x10   : > { %p512_p1 = scmp.lt.u32.totalorder %s653_s12, %s734_s0  ;;  %p513_p2 = scmp.lt.u32.totalorder %s511_s20, %s506_s17 }
  0x11   : > { %p509_p13 = pnand %p508_p12, %p507_p11  ;;  %p515_p4 = scmp.lt.u32.totalorder %s506_s17, %s653_s12 }
  0x12   : > { %p514_p3 = por %p513_p2, %p512_p1 }
  0x13   : > { %p510_p0 = pneg %p509_p13 }
  0x14   : > { %p516_p5 = por %p515_p4, %p514_p3 }
  0x16   : > { %p517_p6 = pnand %p516_p5, %p510_p0 }
  0x18   : > { %520 = shalt.err (!%p517_p6)
}
  0x19   : > { %s521_s28 = scalar_lea.vmem %s655_s14, 128  ;;  %s572_s7 = smov [#allocation2]  }
  0x1a   : > { %p522_p11 = scmp.ne.s32.totalorder %s655_s14, %s521_s28  ;;  %s526_s8 = sshll.u32 %s572_s7, 4  ;;  %s527_s8 = int_to_ptr.vmem [resolvable:$false] %s526_s8 }
  0x1b   : > { %s528_s9 = scalar_lea.vmem %s527_s8, 256  ;;  %p529_p10 = scmp.lt.s32.totalorder %s655_s14, %s527_s8 }
  0x1c   : > { %p524_p13 = pnand %p522_p11, %p508_p12  ;;  %p530_p1 = scmp.lt.s32.totalorder %s528_s9, %s521_s28 }
  0x1e   : > { %p525_p9 = pneg %p524_p13  ;;  %p531_p2 = por %p530_p1, %p529_p10 }
  0x20   : > { %p532_p3 = pnand %p531_p2, %p525_p9 }
  0x22   : > { %535 = shalt.err (!%p532_p3)
}
  0x23   : > { %466 = dma.hbm_to_vmem [thread:$0]  (!%p657_p8), %s653_s12, 128, %s655_s14, %s214_s16  }
  0x24   : > { %p743_p0 = scmp.lt.s32.totalorder %s570_s24, 3  ;;  %p744_p4 = scmp.ge.s32.totalorder %s570_s24, 1 }
  0x26   : > { %p242_p12 = pnand %p744_p4, %p743_p0 }
  0x27   : > { %s247_s10 = sand.u32 (!%p242_p12), 1, %s562_s22  }
  0x28   : > { %245 = sbr.rel (%p242_p12) target bundleno = 538 (0x21a), region = 44  ;;  %s451_s11 = sshll.u32 (!%p242_p12), %s247_s10, 3 }
  0x29   : > { %s248_s13 = scalar_lea.sflag (!%p242_p12), [#allocation3], %s247_s10  ;;  %s251_s17 = scalar_lea.vmem (!%p242_p12), [#allocation2], %s451_s11 }
  0x2f   : > { %553 = dma.done.wait (%p644_p7), %s248_s13, 128  }
  0x30   : > { %555 = vsyncadd (%p644_p7), %s248_s13, 4294967168  ;;  %vm296_vm0 = vcmask 259072   ;;  %v295_v0 = vld [vmem:[%s251_s17 + $0x1] sm:$0x3f]  ;;  %p285_p8 = scmp.lt.s32.totalorder %s627_s25, 1 }
  0x31   : > { %v297_v1 = vsel %vm296_vm0, %v295_v0, 0.0  ;;  %v453_v11 = vld [vmem:[%s737_s3] ss:$0 sm:$0xff] }
  0x32   : > { %298 = vadd.xlane.f32.xlu0 %v297_v1  ;;  %s750_s25 = smov (!%p285_p8, %s627_s25), 1  ;;  %v454_v13 = vld [vmem:[%s738_s4] ss:$0 sm:$0xff] }
  0x33   : > { %s287_s15 = scalar_lea.vmem %s735_s1, %s750_s25  ;;  %s290_s21 = scalar_lea.vmem %s736_s2, %s750_s25  ;;  %v455_v23 = vld [vmem:[%s739_s5] ss:$0 sm:$0xff] }
  0x34   : > { %v456_v15 = vld [vmem:[%s287_s15] ss:$0 sm:$0xff]  ;;  %v334_v25 = vadd.f32 %v455_v23, %v295_v0  ;;  %s452_s7 = sshll.u32 %s750_s25, 3 }
  0x35   : > { %v458_v24 = vld [vmem:[%s290_s21] ss:$0 sm:$0xff]  ;;  %s294_s10 = scalar_lea.vmem %s740_s6, %s452_s7 }
  0xbf   : > { %v299_v2 = vpop.xlane.xlu0 %298 }
  0xc0   : > { %v301_v3 = vmul.f32 0.03125, %v299_v2 }
  0xc2   : > { %v302_v4 = vsub.f32 %v295_v0, %v301_v3 }
  0xc4   : > { %v303_v5 = vmul.f32 %v302_v4, %v302_v4 }
  0xc6   : > { %v304_v6 = vsel %vm296_vm0, %v303_v5, 0.0 }
  0xc7   : > { %305 = vadd.xlane.f32.xlu0 %v304_v6 }
 0x154   : > { %v306_v7 = vpop.xlane.xlu0 %305 }
 0x155   : > { %v307_v8 = vmul.f32 0.03125, %v306_v7 }
 0x157   : > { %v308_v9 = vadd.f32 1e-05, %v307_v8 }
 0x159   : > { %500 = vrsqrt.f32 %v308_v9 }
 0x163   : > { %v501_v10 = vpop.eup %500 }
 0x164   : > { %v310_v12 = vmul.f32 %v501_v10, %v302_v4 }
 0x166   : > { %v318_v14 = vmul.f32 %v453_v11, %v310_v12 }
 0x168   : > { %v326_v16 = vadd.f32 %v454_v13, %v318_v14 }
 0x16a   : > { %v343_v17 = vmul.f32 %v456_v15, %v326_v16 }
 0x16c   : > { %v344_v18 = vsel %vm296_vm0, %v343_v17, 0.0 }
 0x16d   : > { %345 = vadd.xlane.f32.xlu1 %v344_v18 }
 0x1fa   : > { %v346_v19 = vpop.xlane.xlu1 %345 }
 0x1fb   : > { %v457_v20 = vmul.f32 -1.442695, %v346_v19 }
 0x1fd   : > { %502 = vpow2.f32 %v457_v20 }
 0x207   : > { %v503_v21 = vpop.eup %502 }
 0x208   : > { %v350_v22 = vadd.f32 1.0, %v503_v21 }
 0x20a   : > { %504 = vrcp.f32 %v350_v22 }
 0x214   : > { %v505_v26 = vpop.eup %504 }
 0x215   : > { %v359_v27 = vmul.f32 %v505_v26, %v458_v24 }
 0x217   : > { %v360_v28 = vadd.f32 %v359_v27, %v334_v25 }
 0x219   : > { %361 = vst.msk [vmem:[%s294_s10] sm:$0x3f] %vm296_vm0, %v360_v28 }
 0x21a PF: > { %p16_p7 = scmp.ge.s32.totalorder %s630_s26, 4   ;;  %s745_s21 = smov %s562_s22 }
 0x21b   : > { %s746_s22 = smov %s566_s23  ;;  %s747_s23 = smov %s640_s29 }
 0x21c   : > { %s748_s24 = smov %s630_s26  ;;  %18 = sbr.rel (!%p16_p7) target bundleno = 3 (0x3), region = 90 }
 0x223   :  { %381 = vsyncpa [#allocation3], 1 }
 0x224   :  { %383 = vsyncpa [#allocation3 + $0x1], 1 }

</bundles_post_ra>
